<compile_context>
chip_gen: v6e
topology: v6e:2x2x1
jax: 0.10.0
libtpu: 0.0.40
codegen_flags: <defaults>
</compile_context>

<pallas_src>
import functools
import math

import jax
import jax.numpy as jnp
from jax.experimental import pallas as pl
from jax.experimental.pallas import tpu as pltpu


def _round_up(n, m):
    return ((n + m - 1) // m) * m


def _layernorm_kernel(x_ref, a_ref, b_ref, o_ref, *, eps, features):
    x = x_ref[...].astype(jnp.float32)                       # (tr, F)

    mean = jnp.sum(x, axis=-1, keepdims=True) * (1.0 / features)
    d = x - mean

    # torch.std default: unbiased (Bessel's correction, divide by N-1).
    # TODO(synk): features == 1 divides by zero -> NaN, same as torch.std(N=1).
    var = jnp.sum(d * d, axis=-1, keepdims=True) * (1.0 / (features - 1))
    t = jnp.sqrt(var) + eps

    # Per-row reciprocal on the EUP (free slot) + one Newton-Raphson step to
    # recover full f32 accuracy; avoids a per-element VALU divide.
    inv = pl.reciprocal(t, approx=True)
    inv = inv * (2.0 - t * inv)

    # a_ref / b_ref are already float32 (cast once in the wrapper, resident).
    o_ref[...] = (a_ref[...] * (d * inv) + b_ref[...]).astype(o_ref.dtype)


def _vmem_config():
    """(tile working-set budget, scoped vmem limit) gated by chip generation."""
    vmem_cap = None
    try:
        info = pltpu.get_tpu_info()
        vmem_cap = getattr(info, "vmem_capacity_bytes", None)
    except Exception:
        vmem_cap = None
    if vmem_cap is not None and vmem_cap >= 100 * 1024 * 1024:
        # v5e / v6e: 128 MiB VMEM per TensorCore -> big tiles, high limit.
        return 64 * 1024 * 1024, 96 * 1024 * 1024
    # v7x (64 MiB / TC) or unknown: stay conservative.
    return 16 * 1024 * 1024, 48 * 1024 * 1024


def _pick_tile_rows(rows, features, x_itemsize, sublane, vmem_budget_bytes):
    """Largest row tile that keeps the pipelined working set under budget."""
    # VMEM lane-pads the last dim to 128 for layout purposes.
    f_vmem = _round_up(max(features, 1), 128)
    # Per resident row: 2 double-buffered input + 2 double-buffered output
    # buffers (x dtype) plus ~5 full-tile f32 temporaries in the body
    # (x_f32, d, d*d, scaled, y) — the review's corrected footprint model.
    per_row = f_vmem * (4 * x_itemsize + 5 * 4)
    tr = max(sublane, vmem_budget_bytes // per_row)
    tr = min(tr, 1024)
    tr = (tr // sublane) * sublane
    # Aim for >= 4 grid steps (>= 2 per TensorCore on v7x) so the DMA
    # pipeline overlaps compute.
    if rows >= 4 * sublane:
        quarter = _round_up(-(-rows // 4), sublane)
        tr = min(tr, max(quarter, sublane))
    # Don't exceed the (sublane-rounded) number of real rows.
    tr = min(tr, _round_up(max(rows, 1), sublane))
    return max(sublane, tr)


def layer_norm(x, a_2, b_2, eps=1e-6):
    """x: (..., features). a_2, b_2: (features,)."""
    features = x.shape[-1]
    lead_shape = x.shape[:-1]
    rows = math.prod(lead_shape) if lead_shape else 1

    # Free reshape (contiguous collapse) — no HBM copy.
    x2 = x.reshape(rows, features)

    # a_2 / b_2 cast to f32 once here; tiny (1, F) arrays kept resident in VMEM.
    a = a_2.astype(jnp.float32).reshape(1, features)
    b = b_2.astype(jnp.float32).reshape(1, features)

    itemsize = jnp.dtype(x.dtype).itemsize
    sublane = {4: 8, 2: 16, 1: 32}.get(itemsize, 8)
    vmem_budget, vmem_limit = _vmem_config()
    tr = _pick_tile_rows(rows, features, itemsize, sublane, vmem_budget)

    # Partial last block: OOB tail-row reads are don't-care (rows are
    # independent), OOB writes are dropped by Pallas — no padding, no slicing.
    grid = (pl.cdiv(rows, tr),)

    # TODO(synk): for very narrow features (< 128) lanes are underused; a
    # row-packing layout (k = 128 // features rows per lane row) would recover
    # VPU utilization, but HBM traffic is already exact without it.

    kernel = functools.partial(_layernorm_kernel, eps=float(eps), features=features)

    out = pl.pallas_call(
        kernel,
        out_shape=jax.ShapeDtypeStruct((rows, features), x.dtype),
        grid_spec=pltpu.PrefetchScalarGridSpec(
            num_scalar_prefetch=0,
            grid=grid,
            in_specs=[
                # Full-extent feature axis: legal even if not a multiple of 128.
                pl.BlockSpec((tr, features), lambda i: (i, 0)),
                pl.BlockSpec((1, features), lambda i: (0, 0)),   # a_2 resident
                pl.BlockSpec((1, features), lambda i: (0, 0)),   # b_2 resident
            ],
            out_specs=pl.BlockSpec((tr, features), lambda i: (i, 0)),
        ),
        compiler_params=pltpu.CompilerParams(
            dimension_semantics=("parallel",),
            vmem_limit_bytes=vmem_limit,
        ),
    )(x2, a, b)

    return out.reshape(*lead_shape, features)


if __name__ == "__main__":
    key = jax.random.PRNGKey(0)
    batch, seq, hidden = 2, 8, 32

    x = jax.random.normal(key, (batch, seq, hidden), dtype=jnp.float32)
    # nn.Parameter(torch.ones(features)) / nn.Parameter(torch.zeros(features))
    a_2 = jnp.ones((hidden,), dtype=jnp.float32)
    b_2 = jnp.zeros((hidden,), dtype=jnp.float32)

    y = layer_norm(x, a_2, b_2, eps=1e-6)
    y = jax.block_until_ready(y)

    # Reference check in plain JAX (unbiased std, eps added to std).
    mean = jnp.mean(x, axis=-1, keepdims=True)
    std = jnp.sqrt(jnp.sum((x - mean) ** 2, axis=-1, keepdims=True) / (hidden - 1))
    ref = a_2 * (x - mean) / (std + 1e-6) + b_2
    assert jnp.allclose(y, ref, atol=1e-4, rtol=1e-4), "mismatch vs reference"

    print("KERNEL_OK")
</pallas_src>

<mosaic_0001>
module attributes {stable_mosaic.version = 11 : i64} {
  func.func @_layernorm_kernel(%arg0: i32, %arg1: memref<16x32xf32, #tpu.memory_space<vmem>>, %arg2: memref<1x32xf32, #tpu.memory_space<vmem>>, %arg3: memref<1x32xf32, #tpu.memory_space<vmem>>, %arg4: memref<16x32xf32, #tpu.memory_space<vmem>>) attributes {dimension_semantics = [#tpu.dimension_semantics<parallel>], iteration_bounds = array<i64: 1>, scalar_prefetch = 0 : i64, scratch_operands = 0 : i64, tpu.core_type = #tpu.core_type<tc>, window_params = [{transform_indices = @transform_0, window_bounds = array<i64: 16, 32>}, {pipeline_mode = #tpu.pipeline_mode<synchronous>, transform_indices = @transform_1, window_bounds = array<i64: 1, 32>}, {pipeline_mode = #tpu.pipeline_mode<synchronous>, transform_indices = @transform_2, window_bounds = array<i64: 1, 32>}, {transform_indices = @transform_3, window_bounds = array<i64: 16, 32>}]} {
    %c0 = arith.constant 0 : index
    %c0_0 = arith.constant 0 : index
    %0 = vector.load %arg1[%c0, %c0_0] : memref<16x32xf32, #tpu.memory_space<vmem>>, vector<16x32xf32>
    %cst = arith.constant dense<0.000000e+00> : vector<16xf32>
    %1 = vector.multi_reduction <add>, %0, %cst [1] : vector<16x32xf32> to vector<16xf32>
    %2 = vector.shape_cast %1 : vector<16xf32> to vector<16x1xf32>
    %cst_1 = arith.constant 3.125000e-02 : f32
    %3 = vector.broadcast %cst_1 : f32 to vector<16x1xf32>
    %4 = arith.mulf %2, %3 : vector<16x1xf32>
    %5 = vector.broadcast %4 : vector<16x1xf32> to vector<16x32xf32>
    %6 = arith.subf %0, %5 : vector<16x32xf32>
    %7 = arith.mulf %6, %6 : vector<16x32xf32>
    %cst_2 = arith.constant dense<0.000000e+00> : vector<16xf32>
    %8 = vector.multi_reduction <add>, %7, %cst_2 [1] : vector<16x32xf32> to vector<16xf32>
    %9 = vector.shape_cast %8 : vector<16xf32> to vector<16x1xf32>
    %cst_3 = arith.constant 0.0322580636 : f32
    %10 = vector.broadcast %cst_3 : f32 to vector<16x1xf32>
    %11 = arith.mulf %9, %10 : vector<16x1xf32>
    %12 = math.sqrt %11 : vector<16x1xf32>
    %cst_4 = arith.constant 9.99999997E-7 : f32
    %13 = vector.broadcast %cst_4 : f32 to vector<16x1xf32>
    %14 = arith.addf %12, %13 : vector<16x1xf32>
    %15 = tpu.reciprocal %14 {approx = true} : vector<16x1xf32> -> vector<16x1xf32>
    %16 = arith.mulf %14, %15 : vector<16x1xf32>
    %cst_5 = arith.constant 2.000000e+00 : f32
    %17 = vector.broadcast %cst_5 : f32 to vector<16x1xf32>
    %18 = arith.subf %17, %16 : vector<16x1xf32>
    %19 = arith.mulf %15, %18 : vector<16x1xf32>
    %c0_6 = arith.constant 0 : index
    %c0_7 = arith.constant 0 : index
    %20 = vector.load %arg2[%c0_6, %c0_7] : memref<1x32xf32, #tpu.memory_space<vmem>>, vector<1x32xf32>
    %21 = vector.broadcast %19 : vector<16x1xf32> to vector<16x32xf32>
    %22 = arith.mulf %6, %21 : vector<16x32xf32>
    %23 = vector.broadcast %20 : vector<1x32xf32> to vector<16x32xf32>
    %24 = arith.mulf %23, %22 : vector<16x32xf32>
    %c0_8 = arith.constant 0 : index
    %c0_9 = arith.constant 0 : index
    %25 = vector.load %arg3[%c0_8, %c0_9] : memref<1x32xf32, #tpu.memory_space<vmem>>, vector<1x32xf32>
    %26 = vector.broadcast %25 : vector<1x32xf32> to vector<16x32xf32>
    %27 = arith.addf %24, %26 : vector<16x32xf32>
    %c0_10 = arith.constant 0 : index
    %c0_11 = arith.constant 0 : index
    %28 = vector.load %arg4[%c0_10, %c0_11] : memref<16x32xf32, #tpu.memory_space<vmem>>, vector<16x32xf32>
    tpu.vector_store %arg4[%c0_10, %c0_11], %27 {strides = array<i32>} : memref<16x32xf32, #tpu.memory_space<vmem>>, vector<16x32xf32>,
    return
  }
  func.func @transform_0(%arg0: i32) -> (i32, i32) {
    %c0_i32 = arith.constant 0 : i32
    %c0_i32_0 = arith.constant 0 : i32
    return %arg0, %c0_i32 : i32, i32
  }
  func.func @transform_1(%arg0: i32) -> (i32, i32) {
    %c0_i32 = arith.constant 0 : i32
    %c0_i32_0 = arith.constant 0 : i32
    %c0_i32_1 = arith.constant 0 : i32
    return %c0_i32, %c0_i32_0 : i32, i32
  }
  func.func @transform_2(%arg0: i32) -> (i32, i32) {
    %c0_i32 = arith.constant 0 : i32
    %c0_i32_0 = arith.constant 0 : i32
    %c0_i32_1 = arith.constant 0 : i32
    return %c0_i32, %c0_i32_0 : i32, i32
  }
  func.func @transform_3(%arg0: i32) -> (i32, i32) {
    %c0_i32 = arith.constant 0 : i32
    %c0_i32_0 = arith.constant 0 : i32
    return %arg0, %c0_i32 : i32, i32
  }
}

</mosaic_0001>

<bundles_post_ra>
// kernel: tpu_custom_call.1
= control target key start
LH: loop header
LB: loop body
LE: loop exit
PB: predicated region body
PF: predicated region fallthrough
CT: control target
= control target key end

     0   :  { %8 = vsyncpa [#allocation3], 0  ;;  %s221_s0 = inlined_call_operand.hbm [shape: f32[16,32], index: 0, kind: input, shape index: {}]   ;;  %s222_s1 = inlined_call_operand.vmem [shape: f32[1,32], index: 1, kind: input, shape index: {}]   ;;  %s223_s2 = inlined_call_operand.vmem [shape: f32[1,32], index: 2, kind: input, shape index: {}]   ;;  %s224_s3 = inlined_call_operand.hbm [shape: f32[16,32], index: 3, kind: output, shape index: {}]  }
   0x1   :  { %9 = vsyncpa [#allocation4], 0  ;;  %s173_s12 = smov [#allocation2]  }
   0x2   :  { %s15_s13 = sshll.u32 %s173_s12, 4  ;;  %s16_s13 = int_to_ptr.vmem [resolvable:$true] %s15_s13 }
   0x3   :  { %s137_s14 = scalar_lea.vmem %s16_s13, 256  ;;  %p142_p1 = scmp.lt.s32.totalorder %s16_s13, %s16_s13 }
   0x4   :  { %p138_p0 = scmp.ne.s32.totalorder %s16_s13, %s137_s14  ;;  %p143_p2 = scmp.lt.s32.totalorder %s137_s14, %s137_s14 }
   0x6   :  { %p144_p3 = por %p143_p2, %p142_p1 }
   0x8   :  { %p145_p4 = pnand %p144_p3, %p138_p0 }
   0xa   :  { %148 = shalt.err (!%p145_p4)
}
   0xb   :  { %s174_s15 = smov 128   ;;  %s175_s16 = smov 8  }
   0xc   :  { %21 = dma.hbm_to_vmem [thread:$0]  %s221_s0, 256, %s16_s13, [#allocation3], %s174_s15, %s174_s15, %s175_s16  }
   0xd   :  { %169 = dma.done.wait [#allocation3], 256  }
   0xe   :  { %170 = vsyncadd [#allocation3], 4294967040  ;;  %vm31_vm0 = vcmask 261120   ;;  %v29_v0 = vld [vmem:[#allocation2] sm:$0xff]  ;;  %v30_v1 = vld [vmem:[#allocation2 + $0x8] sm:$0xff]  ;;  %s176_s22 = smov [#allocation5]  }
   0xf   :  { %v32_v2 = vsel %vm31_vm0, %v29_v0, 0.0  ;;  %v35_v3 = vsel %vm31_vm0, %v30_v1, 0.0  ;;  %v115_v36 = vld [vmem:[%s222_s1] ss:$0 sm:$0xff]  ;;  %s103_s23 = sshll.u32 %s176_s22, 4  ;;  %s104_s23 = int_to_ptr.vmem [resolvable:$true] %s103_s23 }
  0x10   :  { %33 = vadd.xlane.f32.xlu0 %v32_v2  ;;  %v116_v39 = vld [vmem:[%s223_s2] ss:$0 sm:$0xff]  ;;  %s149_s1 = scalar_lea.vmem %s104_s23, 256  ;;  %p154_p6 = scmp.lt.s32.totalorder %s104_s23, %s104_s23 }
  0x11   :  { %p150_p5 = scmp.ne.s32.totalorder %s104_s23, %s149_s1  ;;  %p155_p7 = scmp.lt.s32.totalorder %s149_s1, %s149_s1 }
  0x13   :  { %p156_p8 = por %p155_p7, %p154_p6 }
  0x14   :  { %36 = vadd.xlane.f32.xlu0 %v35_v3 }
  0x15   :  { %p157_p9 = pnand %p156_p8, %p150_p5 }
  0x99   :  { %v34_v4 = vpop.xlane.xlu0 %33 }
  0x9a   :  { %v38_v5 = vmul.f32 0.03125, %v34_v4 }
  0x9c   :  { %v40_v6 = vsub.f32 %v29_v0, %v38_v5 }
  0x9d   :  { %v37_v7 = vpop.xlane.xlu0 %36 }
  0x9e   :  { %v39_v8 = vmul.f32 0.03125, %v37_v7  ;;  %v42_v9 = vmul.f32 %v40_v6, %v40_v6 }
  0xa0   :  { %v41_v10 = vsub.f32 %v30_v1, %v39_v8  ;;  %v44_v11 = vsel %vm31_vm0, %v42_v9, 0.0 }
  0xa1   :  { %45 = vadd.xlane.f32.xlu1 %v44_v11 }
  0xa2   :  { %v43_v12 = vmul.f32 %v41_v10, %v41_v10 }
  0xa4   :  { %v47_v13 = vsel %vm31_vm0, %v43_v12, 0.0 }
  0xa5   :  { %48 = vadd.xlane.f32.xlu1 %v47_v13 }
 0x12a   :  { %v46_v14 = vpop.xlane.xlu1 %45 }
 0x12b   :  { %v50_v15 = vmul.f32 0.032258064, %v46_v14 }
 0x12d   :  { %121 = vrsqrt.f32 %v50_v15  ;;  %vm54_vm1 = vcmp.eq.f32.partialorder %v50_v15, inf  ;;  %v57_v20 = vand.u32 2147483648, %v50_v15  ;;  %vm56_vm2 = vcmp.eq.f32.partialorder %v50_v15, 0.0 }
 0x12e   :  { %v49_v16 = vpop.xlane.xlu1 %48 }
 0x12f   :  { %v51_v17 = vmul.f32 0.032258064, %v49_v16 }
 0x131   :  { %123 = vrsqrt.f32 %v51_v17  ;;  %vm61_vm3 = vcmp.eq.f32.partialorder %v51_v17, inf  ;;  %v64_v26 = vand.u32 2147483648, %v51_v17  ;;  %vm63_vm4 = vcmp.eq.f32.partialorder %v51_v17, 0.0 }
 0x13a   :  { %v122_v18 = vpop.eup %121 }
 0x13b   :  { %v53_v19 = vmul.f32 %v122_v18, %v50_v15 }
 0x13d   :  { %v55_v21 = vsel %vm54_vm1, %v50_v15, %v53_v19 }
 0x13e   :  { %v124_v22 = vpop.eup %123  ;;  %v58_v23 = vsel %vm56_vm2, %v57_v20, %v55_v21 }
 0x13f   :  { %v60_v24 = vmul.f32 %v124_v22, %v51_v17  ;;  %v66_v25 = vadd.f32 1e-06, %v58_v23 }
 0x141   :  { %v62_v27 = vsel %vm61_vm3, %v51_v17, %v60_v24  ;;  %125 = vrcp.f32 %v66_v25 }
 0x142   :  { %v65_v28 = vsel %vm63_vm4, %v64_v26, %v62_v27 }
 0x143   :  { %v67_v29 = vadd.f32 1e-06, %v65_v28 }
 0x145   :  { %127 = vrcp.f32 %v67_v29 }
 0x14e   :  { %v126_v30 = vpop.eup %125 }
 0x14f   :  { %v70_v31 = vmul.f32 %v126_v30, %v66_v25 }
 0x151   :  { %v72_v32 = vsub.f32 2.0, %v70_v31 }
 0x152   :  { %v128_v33 = vpop.eup %127 }
 0x153   :  { %v71_v34 = vmul.f32 %v128_v33, %v67_v29  ;;  %v74_v35 = vmul.f32 %v126_v30, %v72_v32 }
 0x155   :  { %v73_v37 = vsub.f32 2.0, %v71_v34  ;;  %v77_v38 = vmul.f32 %v74_v35, %v40_v6 }
 0x157   :  { %v75_v40 = vmul.f32 %v128_v33, %v73_v37  ;;  %v85_v41 = vmul.f32 %v115_v36, %v77_v38 }
 0x159   :  { %v78_v42 = vmul.f32 %v75_v40, %v41_v10  ;;  %v94_v43 = vadd.f32 %v116_v39, %v85_v41 }
 0x15b   :  { %v86_v44 = vmul.f32 %v115_v36, %v78_v42  ;;  %96 = vst.msk [vmem:[#allocation5] sm:$0xff] %vm31_vm0, %v94_v43 }
 0x15d   :  { %v95_v45 = vadd.f32 %v116_v39, %v86_v44 }
 0x15f   :  { %97 = vst.msk [vmem:[#allocation5 + $0x8] sm:$0xff] %vm31_vm0, %v95_v45 }
 0x160   :  { %160 = shalt.err (!%p157_p9)
}
 0x161   :  { %109 = dma.vmem_to_hbm [thread:$0]  %s104_s23, 256, %s224_s3, [#allocation4], %s174_s15, %s174_s15, %s175_s16  }
 0x162   :  { %171 = dma.done.wait [#allocation4], 256  }
 0x163   :  { %172 = vsyncadd [#allocation4], 4294967040 }
 0x164   :  { %113 = vsyncpa [#allocation3], 1 }
 0x165   :  { %114 = vsyncpa [#allocation4], 1 }

</bundles_post_ra>
